<compile_context>
chip_gen: v7x
topology: tpu7x:2x2x1
jax: 0.10.0
libtpu: 0.0.40
codegen_flags: <defaults>
</compile_context>

<pallas_src>
import jax
import jax.numpy as jnp
from jax.experimental import pallas as pl
from jax.experimental.pallas import tpu as pltpu


def mlp_kernel(x_ref,
               w1_ref, b1_ref, w2_ref, b2_ref, w3_ref, b3_ref,
               o_ref):
    x = x_ref[...]

    # fc1 + relu
    h = jnp.dot(x, w1_ref[...], preferred_element_type=jnp.float32) + b1_ref[...]
    h = jnp.maximum(h, 0.0)

    # fc2 + relu
    h = jnp.dot(h, w2_ref[...], preferred_element_type=jnp.float32) + b2_ref[...]
    h = jnp.maximum(h, 0.0)

    # dropout1 (p=0.1): identity at inference

    # fc3 + softmax over the 2 classes (explicit two-column form, no lane reduction)
    logits = jnp.dot(h, w3_ref[...], preferred_element_type=jnp.float32) + b3_ref[...]
    l0 = logits[:, 0:1]
    l1 = logits[:, 1:2]
    # p0 = exp(l0) / (exp(l0) + exp(l1)) = 1 / (1 + exp(l1 - l0)); overflow of exp
    # to +inf yields p0 -> 0 correctly (IEEE), so this is numerically safe.
    p0 = 1.0 / (1.0 + jnp.exp(l1 - l0))
    p1 = 1.0 - p0
    o_ref[...] = jnp.concatenate([p0, p1], axis=-1)


def _round_up(n, m):
    return ((n + m - 1) // m) * m


def mymodule3_forward(x, params, *, tile_b=512):
    """x: (B, 9) float32; params: [(w1,b1),(w2,b2),(w3,b3)] with w of shape (in,out)
    and b of shape (1,out)."""
    B = x.shape[0]
    (w1, b1), (w2, b2), (w3, b3) = params

    # Batch tile: multiple of 8 (sublane), capped by the (padded) batch size.
    tb = min(tile_b, _round_up(max(B, 1), 8))
    Bp = _round_up(B, tb)
    if Bp != B:
        x = jnp.pad(x, ((0, Bp - B), (0, 0)))

    grid = (Bp // tb,)
    const2 = lambda i: (0, 0)  # weights/biases stay VMEM-resident (no re-DMA)

    out = pl.pallas_call(
        mlp_kernel,
        out_shape=jax.ShapeDtypeStruct((Bp, 2), jnp.float32),
        grid=grid,
        in_specs=[
            pl.BlockSpec((tb, 9), lambda i: (i, 0)),      # X: tiled along batch
            pl.BlockSpec(w1.shape, const2),               # (9, 60)
            pl.BlockSpec(b1.shape, const2),               # (1, 60)
            pl.BlockSpec(w2.shape, const2),               # (60, 60)
            pl.BlockSpec(b2.shape, const2),               # (1, 60)
            pl.BlockSpec(w3.shape, const2),               # (60, 2)
            pl.BlockSpec(b3.shape, const2),               # (1, 2)
        ],
        out_specs=pl.BlockSpec((tb, 2), lambda i: (i, 0)),
        compiler_params=pltpu.CompilerParams(
            dimension_semantics=("parallel",),            # v7x: shard batch across 2 TCs
        ),
    )(x, w1, b1, w2, b2, w3, b3)

    return out[:B]


def init_params(key):
    """Deterministic init mimicking PyTorch nn.Linear default
    (uniform +-1/sqrt(fan_in)). Weights stored transposed, i.e. shape (in, out)."""
    dims = [(9, 60), (60, 60), (60, 2)]
    params = []
    for (fan_in, fan_out) in dims:
        key, kw, kb = jax.random.split(key, 3)
        bound = 1.0 / jnp.sqrt(jnp.float32(fan_in))
        w = jax.random.uniform(kw, (fan_in, fan_out), jnp.float32, -bound, bound)
        b = jax.random.uniform(kb, (1, fan_out), jnp.float32, -bound, bound)
        params.append((w, b))
    return params


if __name__ == "__main__":
    key = jax.random.PRNGKey(0)
    key, kx = jax.random.split(key)
    B = 8
    x = jax.random.normal(kx, (B, 9), jnp.float32)
    params = init_params(key)

    out = mymodule3_forward(x, params)
    out = jax.block_until_ready(out)

    # reference check against plain JAX
    def ref(x, params):
        (w1, b1), (w2, b2), (w3, b3) = params
        h = jnp.maximum(x @ w1 + b1, 0.0)
        h = jnp.maximum(h @ w2 + b2, 0.0)
        return jax.nn.softmax(h @ w3 + b3, axis=-1)

    expected = ref(x, params)

    assert out.shape == (B, 2)
    assert jnp.allclose(jnp.sum(out, axis=-1), 1.0, atol=1e-5)
    assert jnp.allclose(out, expected, atol=1e-5, rtol=1e-5)
    print("KERNEL_OK")
</pallas_src>

<mosaic_0001>
module attributes {stable_mosaic.version = 11 : i64} {
  func.func @mlp_kernel(%arg0: i32, %arg1: memref<8x9xf32, #tpu.memory_space<vmem>>, %arg2: memref<9x60xf32, #tpu.memory_space<vmem>>, %arg3: memref<1x60xf32, #tpu.memory_space<vmem>>, %arg4: memref<60x60xf32, #tpu.memory_space<vmem>>, %arg5: memref<1x60xf32, #tpu.memory_space<vmem>>, %arg6: memref<60x2xf32, #tpu.memory_space<vmem>>, %arg7: memref<1x2xf32, #tpu.memory_space<vmem>>, %arg8: memref<8x2xf32, #tpu.memory_space<vmem>>) attributes {dimension_semantics = [#tpu.dimension_semantics<parallel>], iteration_bounds = array<i64: 1>, scalar_prefetch = 0 : i64, scratch_operands = 0 : i64, tpu.core_type = #tpu.core_type<tc>, window_params = [{transform_indices = @transform_0, window_bounds = array<i64: 8, 9>}, {pipeline_mode = #tpu.pipeline_mode<synchronous>, transform_indices = @transform_1, window_bounds = array<i64: 9, 60>}, {pipeline_mode = #tpu.pipeline_mode<synchronous>, transform_indices = @transform_2, window_bounds = array<i64: 1, 60>}, {pipeline_mode = #tpu.pipeline_mode<synchronous>, transform_indices = @transform_3, window_bounds = array<i64: 60, 60>}, {pipeline_mode = #tpu.pipeline_mode<synchronous>, transform_indices = @transform_4, window_bounds = array<i64: 1, 60>}, {pipeline_mode = #tpu.pipeline_mode<synchronous>, transform_indices = @transform_5, window_bounds = array<i64: 60, 2>}, {pipeline_mode = #tpu.pipeline_mode<synchronous>, transform_indices = @transform_6, window_bounds = array<i64: 1, 2>}, {transform_indices = @transform_7, window_bounds = array<i64: 8, 2>}]} {
    %c0 = arith.constant 0 : index
    %c0_0 = arith.constant 0 : index
    %0 = vector.load %arg1[%c0, %c0_0] : memref<8x9xf32, #tpu.memory_space<vmem>>, vector<8x9xf32>
    %c0_1 = arith.constant 0 : index
    %c0_2 = arith.constant 0 : index
    %1 = vector.load %arg2[%c0_1, %c0_2] : memref<9x60xf32, #tpu.memory_space<vmem>>, vector<9x60xf32>
    %cst = arith.constant dense<0.000000e+00> : vector<8x60xf32>
    %2 = tpu.matmul %0, %1, %cst {dimension_numbers = #tpu.dot_dimension_numbers<[1], [0], [0], [1], [0, 0, 1, 1], [], []>} : vector<8x9xf32>, vector<9x60xf32>, vector<8x60xf32> -> vector<8x60xf32>
    %c0_3 = arith.constant 0 : index
    %c0_4 = arith.constant 0 : index
    %3 = vector.load %arg3[%c0_3, %c0_4] : memref<1x60xf32, #tpu.memory_space<vmem>>, vector<1x60xf32>
    %4 = vector.broadcast %3 : vector<1x60xf32> to vector<8x60xf32>
    %5 = arith.addf %2, %4 : vector<8x60xf32>
    %cst_5 = arith.constant 0.000000e+00 : f32
    %6 = vector.broadcast %cst_5 : f32 to vector<8x60xf32>
    %7 = arith.maximumf %5, %6 : vector<8x60xf32>
    %c0_6 = arith.constant 0 : index
    %c0_7 = arith.constant 0 : index
    %8 = vector.load %arg4[%c0_6, %c0_7] : memref<60x60xf32, #tpu.memory_space<vmem>>, vector<60x60xf32>
    %cst_8 = arith.constant dense<0.000000e+00> : vector<8x60xf32>
    %9 = tpu.matmul %7, %8, %cst_8 {dimension_numbers = #tpu.dot_dimension_numbers<[1], [0], [0], [1], [0, 0, 1, 1], [], []>} : vector<8x60xf32>, vector<60x60xf32>, vector<8x60xf32> -> vector<8x60xf32>
    %c0_9 = arith.constant 0 : index
    %c0_10 = arith.constant 0 : index
    %10 = vector.load %arg5[%c0_9, %c0_10] : memref<1x60xf32, #tpu.memory_space<vmem>>, vector<1x60xf32>
    %11 = vector.broadcast %10 : vector<1x60xf32> to vector<8x60xf32>
    %12 = arith.addf %9, %11 : vector<8x60xf32>
    %cst_11 = arith.constant 0.000000e+00 : f32
    %13 = vector.broadcast %cst_11 : f32 to vector<8x60xf32>
    %14 = arith.maximumf %12, %13 : vector<8x60xf32>
    %c0_12 = arith.constant 0 : index
    %c0_13 = arith.constant 0 : index
    %15 = vector.load %arg6[%c0_12, %c0_13] : memref<60x2xf32, #tpu.memory_space<vmem>>, vector<60x2xf32>
    %cst_14 = arith.constant dense<0.000000e+00> : vector<8x2xf32>
    %16 = tpu.matmul %14, %15, %cst_14 {dimension_numbers = #tpu.dot_dimension_numbers<[1], [0], [0], [1], [0, 0, 1, 1], [], []>} : vector<8x60xf32>, vector<60x2xf32>, vector<8x2xf32> -> vector<8x2xf32>
    %c0_15 = arith.constant 0 : index
    %c0_16 = arith.constant 0 : index
    %17 = vector.load %arg7[%c0_15, %c0_16] : memref<1x2xf32, #tpu.memory_space<vmem>>, vector<1x2xf32>
    %18 = vector.broadcast %17 : vector<1x2xf32> to vector<8x2xf32>
    %19 = arith.addf %16, %18 : vector<8x2xf32>
    %20 = vector.extract_strided_slice %19 {offsets = [0, 0], sizes = [8, 1], strides = [1, 1]} : vector<8x2xf32> to vector<8x1xf32>
    %21 = vector.extract_strided_slice %19 {offsets = [0, 1], sizes = [8, 1], strides = [1, 1]} : vector<8x2xf32> to vector<8x1xf32>
    %22 = arith.subf %21, %20 : vector<8x1xf32>
    %23 = math.exp %22 : vector<8x1xf32>
    %cst_17 = arith.constant 1.000000e+00 : f32
    %24 = vector.broadcast %cst_17 : f32 to vector<8x1xf32>
    %25 = arith.addf %24, %23 : vector<8x1xf32>
    %cst_18 = arith.constant 1.000000e+00 : f32
    %26 = vector.broadcast %cst_18 : f32 to vector<8x1xf32>
    %27 = arith.divf %26, %25 : vector<8x1xf32>
    %cst_19 = arith.constant 1.000000e+00 : f32
    %28 = vector.broadcast %cst_19 : f32 to vector<8x1xf32>
    %29 = arith.subf %28, %27 : vector<8x1xf32>
    %30 = tpu.concatenate %27, %29 in 1 : vector<8x1xf32>, vector<8x1xf32> -> vector<8x2xf32>
    %c0_20 = arith.constant 0 : index
    %c0_21 = arith.constant 0 : index
    %31 = vector.load %arg8[%c0_20, %c0_21] : memref<8x2xf32, #tpu.memory_space<vmem>>, vector<8x2xf32>
    tpu.vector_store %arg8[%c0_20, %c0_21], %30 {strides = array<i32>} : memref<8x2xf32, #tpu.memory_space<vmem>>, vector<8x2xf32>,
    return
  }
  func.func @transform_0(%arg0: i32) -> (i32, i32) {
    %c0_i32 = arith.constant 0 : i32
    %c0_i32_0 = arith.constant 0 : i32
    return %arg0, %c0_i32 : i32, i32
  }
  func.func @transform_1(%arg0: i32) -> (i32, i32) {
    %c0_i32 = arith.constant 0 : i32
    %c0_i32_0 = arith.constant 0 : i32
    %c0_i32_1 = arith.constant 0 : i32
    return %c0_i32, %c0_i32_0 : i32, i32
  }
  func.func @transform_2(%arg0: i32) -> (i32, i32) {
    %c0_i32 = arith.constant 0 : i32
    %c0_i32_0 = arith.constant 0 : i32
    %c0_i32_1 = arith.constant 0 : i32
    return %c0_i32, %c0_i32_0 : i32, i32
  }
  func.func @transform_3(%arg0: i32) -> (i32, i32) {
    %c0_i32 = arith.constant 0 : i32
    %c0_i32_0 = arith.constant 0 : i32
    %c0_i32_1 = arith.constant 0 : i32
    return %c0_i32, %c0_i32_0 : i32, i32
  }
  func.func @transform_4(%arg0: i32) -> (i32, i32) {
    %c0_i32 = arith.constant 0 : i32
    %c0_i32_0 = arith.constant 0 : i32
    %c0_i32_1 = arith.constant 0 : i32
    return %c0_i32, %c0_i32_0 : i32, i32
  }
  func.func @transform_5(%arg0: i32) -> (i32, i32) {
    %c0_i32 = arith.constant 0 : i32
    %c0_i32_0 = arith.constant 0 : i32
    %c0_i32_1 = arith.constant 0 : i32
    return %c0_i32, %c0_i32_0 : i32, i32
  }
  func.func @transform_6(%arg0: i32) -> (i32, i32) {
    %c0_i32 = arith.constant 0 : i32
    %c0_i32_0 = arith.constant 0 : i32
    %c0_i32_1 = arith.constant 0 : i32
    return %c0_i32, %c0_i32_0 : i32, i32
  }
  func.func @transform_7(%arg0: i32) -> (i32, i32) {
    %c0_i32 = arith.constant 0 : i32
    %c0_i32_0 = arith.constant 0 : i32
    return %arg0, %c0_i32 : i32, i32
  }
}

</mosaic_0001>

<bundles_post_ra>
// kernel: tpu_custom_call.1
= control target key start
LH: loop header
LB: loop body
LE: loop exit
PB: predicated region body
PF: predicated region fallthrough
CT: control target
= control target key end

     0   :  { %12 = vsyncpa [#allocation3], 0  ;;  %s480_s24 = smov [#allocation2]   ;;  %s617_s0 = inlined_call_operand.vmem [shape: f32[8,9], index: 0, kind: input, shape index: {}]   ;;  %s618_s1 = inlined_call_operand.hbm [shape: f32[9,60], index: 1, kind: input, shape index: {}]   ;;  %s619_s2 = inlined_call_operand.vmem [shape: f32[1,60], index: 2, kind: input, shape index: {}]   ;;  %s620_s3 = inlined_call_operand.vmem [shape: f32[60,60], index: 3, kind: input, shape index: {}]   ;;  %s621_s4 = inlined_call_operand.vmem [shape: f32[1,60], index: 4, kind: input, shape index: {}]   ;;  %s622_s5 = inlined_call_operand.vmem [shape: f32[60,2], index: 5, kind: input, shape index: {}]   ;;  %s623_s6 = inlined_call_operand.vmem [shape: f32[1,2], index: 6, kind: input, shape index: {}]   ;;  %s624_s7 = inlined_call_operand.vmem [shape: f32[8,2], index: 7, kind: output, shape index: {}]  }
   0x1   :  { %s20_s25 = sshll.u32 %s480_s24, 4  ;;  %s456_s28 = scalar_lea.hbm %s618_s1, 256  ;;  %s21_s25 = int_to_ptr.vmem [resolvable:$true] %s20_s25 }
   0x2   :  { %p457_p0 = scmp.ne.s32.totalorder %s618_s1, %s456_s28  ;;  %p460_p1 = scmp.lt.u32.totalorder %s456_s28, %s618_s1 }
   0x4   :  { %p462_p2 = pnand %p460_p1, %p457_p0 }
   0x6   :  { %465 = shalt.err (!%p462_p2)
}
   0x7   :  { %s466_s10 = scalar_lea.vmem %s21_s25, 256  ;;  %p471_p4 = scmp.lt.s32.totalorder %s21_s25, %s21_s25 }
   0x8   :  { %p467_p3 = scmp.ne.s32.totalorder %s21_s25, %s466_s10  ;;  %p472_p5 = scmp.lt.s32.totalorder %s466_s10, %s466_s10 }
   0xa   :  { %p473_p6 = por %p472_p5, %p471_p4 }
   0xc   :  { %p474_p7 = pnand %p473_p6, %p467_p3 }
   0xe   :  { %477 = shalt.err (!%p474_p7)
}
   0xf   :  { %s481_s11 = smov 128   ;;  %s482_s12 = smov 8  }
  0x10   :  { %26 = dma.hbm_to_vmem [thread:$0]  %s618_s1, 256, %s21_s25, [#allocation3], %s481_s11, %s481_s11, %s482_s12  }
  0x11   :  { %478 = dma.done.wait [#allocation3], 256  }
  0x12   :  { %479 = vsyncadd [#allocation3], 4294967040  ;;  %v483_v0 = vmov 0.0|0.0   ;;  %vm484_vm0 = vmmov 0   ;;  %v485_v1 = vmov 0.0   ;;  %vm54_vm1 = vcmask 1040384  }
  0x13   :  { %413 = vmatprep.subr.bf16.mxu0 %v483_v0  ;;  %417 = vmatprep.subr.bf16.mxu1 %v483_v0  ;;  %v41_v2 = vld [vmem:[#allocation2] sm:$0xff]  ;;  %v42_v3 = vld [vmem:[#allocation2 + $0x8] sm:$0x1]  ;;  %vm486_vm2 = vmmov 1   ;;  %v131_v7 = vld [vmem:[%s620_s3 + $0x10] sm:$0xff]  ;;  %vm50_vm4 = vcmask 72704  }
  0x14   :  { %372 = vmatprep.mubr.msk.f32.mxu0 %vm484_vm0, %v485_v1  ;;  %391 = vmatprep.mubr.msk.f32.mxu1 %vm484_vm0, %v485_v1  ;;  %vm415_vm3 = vmpackc.low %vm54_vm1, %vm486_vm2  ;;  %v414_v4 = vpack.c.bf16 %v42_v3, %v41_v2  ;;  %v129_v5 = vld [vmem:[%s620_s3] sm:$0xff]  ;;  %v130_v6 = vld [vmem:[%s620_s3 + $0x8] sm:$0xff]  ;;  %vm148_vm5 = vcmask 1043456   ;;  %vm144_vm7 = vcmask 490496   ;;  %vm329_vm8 = vcmask 7168  }
  0x15   :  { %v418_v8 = vpack.c.bf16 %v130_v6, %v129_v5  ;;  %v132_v9 = vld [vmem:[%s620_s3 + $0x18] sm:$0xff]  ;;  %v40_v10 = vld [vmem:[%s617_s0] sm:$0xff]  ;;  %v134_v13 = vld [vmem:[%s620_s3 + $0x28] sm:$0xff]  ;;  %vm331_vm9 = vcmask 15360  }
  0x16   :  { %416 = vmatpush3.bf16.msk.msra.mxu0 %vm415_vm3, %v414_v4  ;;  %v421_v11 = vpack.c.bf16 %v132_v9, %v131_v7  ;;  %v133_v12 = vld [vmem:[%s620_s3 + $0x20] sm:$0xff]  ;;  %v135_v15 = vld [vmem:[%s620_s3 + $0x30] sm:$0xff]  ;;  %v136_v16 = vld [vmem:[%s620_s3 + $0x38] sm:$0xf] }
  0x17   :  { %419 = vmatpush3.bf16.msra.mxu1 %v418_v8  ;;  %430 = vmatprep.subr.bf16.mxu0 %v483_v0  ;;  %v424_v14 = vpack.c.bf16 %v134_v13, %v133_v12  ;;  %v427_v17 = vpack.c.bf16 %v136_v16, %v135_v15  ;;  %vm573_vm6 = vmpackc.low %vm148_vm5, %vm486_vm2  ;;  %v223_v19 = vld [vmem:[%s622_s5] sm:$0xff]  ;;  %v224_v20 = vld [vmem:[%s622_s5 + $0x8] sm:$0xff] }
  0x18   :  { %420 = vmatprep.subr.bf16.mxu1 %v483_v0  ;;  %v225_v21 = vld [vmem:[%s622_s5 + $0x10] sm:$0xff]  ;;  %v431_v22 = vpack.c.bf16 %v224_v20, %v223_v19  ;;  %v226_v23 = vld [vmem:[%s622_s5 + $0x18] sm:$0xff]  ;;  %v227_v25 = vld [vmem:[%s622_s5 + $0x20] sm:$0xff] }
  0x19   :  { %373 = vmatmul.mubr.msk.f32.vlgmr.msra.gmra.mrb[0].mxu0 %vm50_vm4, %v40_v10  ;;  %v434_v24 = vpack.c.bf16 %v226_v23, %v225_v21  ;;  %v228_v26 = vld [vmem:[%s622_s5 + $0x28] sm:$0xff]  ;;  %v338_v28 = vld [vmem:[%s619_s2] ss:$0 sm:$0xff]  ;;  %v229_v33 = vld [vmem:[%s622_s5 + $0x30] sm:$0xff] }
  0x1a   :  { %410 = vmatprep.mubr.msk.f32.mxu0 %vm484_vm0, %v485_v1  ;;  %432 = vmatpush3.bf16.msra.mxu0 %v431_v22  ;;  %v437_v27 = vpack.c.bf16 %v228_v26, %v227_v25  ;;  %v230_v34 = vld [vmem:[%s622_s5 + $0x38] sm:$0xf]  ;;  %v341_v36 = vld [vmem:[%s621_s4] ss:$0 sm:$0xff]  ;;  %s487_s5 = smov 1   ;;  %s488_s4 = smov 127  }
  0x1b   :  { %422 = vmatpush3.bf16.msra.mxu1 %v421_v11  ;;  %433 = vmatprep.subr.bf16.mxu0 %v483_v0  ;;  %v440_v35 = vpack.c.bf16 %v230_v34, %v229_v33  ;;  %v344_v41 = vld [vmem:[%s623_s6] ss:$0 sm:$0xff] }
  0x1c   :  { %423 = vmatprep.subr.bf16.mxu1 %v483_v0 }
  0x1e   :  { %435 = vmatpush3.bf16.msra.mxu0 %v434_v24 }
  0x1f   :  { %425 = vmatpush3.bf16.msra.mxu1 %v424_v14  ;;  %436 = vmatprep.subr.bf16.mxu0 %v483_v0 }
  0x20   :  { %426 = vmatprep.subr.bf16.mxu1 %v483_v0 }
  0x22   :  { %438 = vmatpush3.bf16.msra.mxu0 %v437_v27 }
  0x23   :  { %429 = vmatpush3.bf16.msk.msra.mxu1 %vm573_vm6, %v427_v17  ;;  %439 = vmatprep.subr.bf16.mxu0 %v483_v0 }
  0x26   :  { %442 = vmatpush3.bf16.msk.msra.mxu0 %vm573_vm6, %v440_v35 }
  0xec   :  { %v124_v29 = vpop.f32.mrb[0].mxu0 }
  0xed   :  { %v125_v30 = vadd.f32 %v338_v28, %v124_v29  ;;  %v374_v31 = vpop.f32.mrb[1].mxu0 }
  0xef   :  { %v128_v32 = vmax.f32 %v125_v30, 0.0 }
  0xf1   :  { %392 = vmatmul.mubr.msk.f32.vlgmr.msra.gmra.mrb[0].mxu1 %vm144_vm7, %v128_v32 }
 0x1c4   :  { %v218_v37 = vpop.f32.mrb[0].mxu1 }
 0x1c5   :  { %v219_v38 = vadd.f32 %v341_v36, %v218_v37  ;;  %v393_v39 = vpop.f32.mrb[1].mxu1 }
 0x1c7   :  { %v222_v40 = vmax.f32 %v219_v38, 0.0 }
 0x1c9   :  { %411 = vmatmul.mubr.msk.f32.vlgmr.msra.gmra.mrb[2].mxu0 %vm144_vm7, %v222_v40 }
 0x29c   :  { %v310_v42 = vpop.f32.mrb[2].mxu0 }
 0x29d   :  { %v311_v43 = vadd.f32 %v344_v41, %v310_v42  ;;  %v412_v44 = vpop.f32.mrb[3].mxu0 }
 0x29f   :  { %315 = vrot.lane.b32.xlu0 %v311_v43, %s487_s5 }
 0x311   :  { %v316_v45 = vpop.permute.xlu0 %315 }
 0x312   :  { %v318_v46 = vsub.f32 %v311_v43, %v316_v45 }
 0x314   :  { %v319_v47 = vmul.f32 1.442695, %v318_v46 }
 0x316   :  { %452 = vpow2.f32 %v319_v47 }
 0x320   :  { %v453_v48 = vpop.eup %452 }
 0x321   :  { %v321_v49 = vadd.f32 1.0, %v453_v48 }
 0x323   :  { %454 = vrcp.f32 %v321_v49 }
 0x32d   :  { %v455_v50 = vpop.eup %454 }
 0x32e   :  { %326 = vrot.lane.b32.xlu0 %v455_v50, %s488_s4  ;;  %v324_v51 = vsub.f32 1.0, %v455_v50 }
 0x3a0   :  { %v327_v52 = vpop.permute.xlu0 %326 }
 0x3a1   :  { %v330_v53 = vsel %vm329_vm8, %v327_v52, %v324_v51 }
 0x3a2   :  { %332 = vst.msk [vmem:[%s624_s7] sm:$0xff] %vm331_vm9, %v330_v53 }
 0x3a3   :  { %337 = vsyncpa [#allocation3], 1 }

</bundles_post_ra>
